<compile_context>
chip_gen: v5e
topology: v5e:2x2
jax: 0.10.0
libtpu: 0.0.40
codegen_flags: <defaults>
</compile_context>

<pallas_src>
import math
import functools

import jax
import jax.numpy as jnp
from jax import lax
from jax.experimental import pallas as pl
from jax.experimental.pallas import tpu as pltpu


# ---------------------------------------------------------------------------
# Trace-time tiling / VMEM budgeting helpers (pure Python ints)
# ---------------------------------------------------------------------------

_VMEM_BUDGET = 20 * 1024 * 1024     # per-step working-set target, safe on v7x
_MIN_CAP = 128


def _round_up(x, m):
    return ((x + m - 1) // m) * m


def _vmem_footprint(bb, tq_t, tk_t, d, dv, in_bytes, out_bytes):
    """Approx per-step VMEM bytes: 2x-buffered blocks + scratch + f32 temps."""
    q_blk = bb * tq_t * d * in_bytes
    k_blk = bb * tk_t * d * in_bytes
    v_blk = bb * tk_t * dv * in_bytes
    o_blk = bb * tq_t * dv * out_bytes
    scratch = bb * tq_t * (2 * 4 + dv * 4) + bb * tq_t * d * in_bytes
    temps = 2 * bb * tq_t * tk_t * 4          # s and p (f32)
    return 2 * (q_blk + k_blk + v_blk + o_blk) + scratch + temps


def _pick_seq_tile(full, cap):
    """Pick a tile <= cap. Prefer a multiple-of-8 divisor of `full` (no
    padding); otherwise return the cap and pad `full` up to a multiple of it
    (bounded tiles + in-kernel bounds masking instead of a full-extent
    fallback that could blow v7x's 64 MiB VMEM)."""
    if full <= cap:
        return full, full
    cap8 = max(8, (cap // 8) * 8)
    best = 0
    t = cap8
    while t >= 8:
        if full % t == 0:
            best = t
            break
        t -= 8
    if best >= cap8 // 2:
        return best, full
    return cap8, _round_up(full, cap8)


def _pick_tiles(Tq, Tk, D, Dv, itemsize, tq_cap, tk_cap):
    tq_cap = max(_MIN_CAP, int(tq_cap))
    tk_cap = max(_MIN_CAP, int(tk_cap))
    while True:
        tq_t, Tq_p = _pick_seq_tile(Tq, tq_cap)
        tk_t, Tk_p = _pick_seq_tile(Tk, tk_cap)
        fp = _vmem_footprint(1, tq_t, tk_t, D, Dv, itemsize, itemsize)
        if fp <= _VMEM_BUDGET or (tq_cap <= _MIN_CAP and tk_cap <= _MIN_CAP):
            return tq_t, Tq_p, tk_t, Tk_p
        if tk_cap > _MIN_CAP and (tk_t >= tq_t or tq_cap <= _MIN_CAP):
            tk_cap = max(_MIN_CAP, tk_cap // 2)
        else:
            tq_cap = max(_MIN_CAP, tq_cap // 2)


def _pick_batch_block(B, Tq_p, Tk_p, tq_t, tk_t, D, Dv, itemsize):
    # Grow sequence tiles before grouping batches (keeps MXU tiles large);
    # only group when the whole per-batch problem fits one (tq_t, tk_t) tile.
    if tq_t != Tq_p or tk_t != Tk_p:
        return 1
    # Keep at least 2 "parallel" grid points when B allows it (v7x dual-TC).
    max_bb = min(16, max(1, B // 2))
    for cand in range(max_bb, 1, -1):
        if B % cand == 0 and _vmem_footprint(
                cand, tq_t, tk_t, D, Dv, itemsize, itemsize) <= _VMEM_BUDGET:
            return cand
    return 1


# ---------------------------------------------------------------------------
# Kernel
# ---------------------------------------------------------------------------

def _sdpa_kernel(vl_ref, q_ref, k_ref, v_ref, o_ref,
                 m_sc, l_sc, acc_sc, qs_sc, *,
                 has_mask, bb, scale, k_valid):
    tk_t = k_ref.shape[1]
    kt = pl.program_id(2)
    last_kt = pl.num_programs(2) - 1

    @pl.when(kt == 0)
    def _init():
        m_sc[...] = jnp.full(m_sc.shape, -jnp.inf, dtype=m_sc.dtype)
        l_sc[...] = jnp.zeros_like(l_sc)
        acc_sc[...] = jnp.zeros_like(acc_sc)
        # Hoist 1/sqrt(d): Q is resident across the key-tile axis, so scale it
        # once per (batch-block, q-tile) instead of every kt.
        qs_sc[...] = q_ref[...] * jnp.asarray(scale, dtype=q_ref.dtype)

    if has_mask:
        b0 = pl.program_id(0) * bb
        vls = [vl_ref[b0 + j] for j in range(bb)]     # per-batch SMEM scalars

    def _compute(apply_vl_mask, apply_bounds_mask):
        # Contract over D without materializing K^T; f32 MXU accumulation.
        s = jnp.einsum("bqd,bkd->bqk", qs_sc[...], k_ref[...],
                       preferred_element_type=jnp.float32)   # (bb, tq, tk)
        if apply_vl_mask or apply_bounds_mask:
            col = lax.broadcasted_iota(jnp.int32, s.shape, 2) + kt * tk_t
        if apply_vl_mask:
            bidx = lax.broadcasted_iota(jnp.int32, (bb, 1, 1), 0)
            vlb = jnp.zeros((bb, 1, 1), jnp.int32)
            for j in range(bb):
                vlb = jnp.where(bidx == j, vls[j], vlb)
            s = jnp.where(col < vlb, s, jnp.float32(-1.0e6))   # d2l fill value
        if apply_bounds_mask:
            # Wrapper padding: keys >= the real Tk never contribute.
            s = jnp.where(col < k_valid, s, jnp.float32(-1.0e30))

        # Online (flash) softmax update.
        m_new = jnp.maximum(m_sc[...], jnp.max(s, axis=-1, keepdims=True))
        alpha = jnp.exp(m_sc[...] - m_new)
        p = jnp.exp(s - m_new)
        l_sc[...] = alpha * l_sc[...] + jnp.sum(p, axis=-1, keepdims=True)
        pv = jnp.einsum("bqk,bkv->bqv", p.astype(v_ref.dtype), v_ref[...],
                        preferred_element_type=jnp.float32)
        acc_sc[...] = alpha * acc_sc[...] + pv
        m_sc[...] = m_new

    bounds = k_valid is not None

    if has_mask:
        tile_start = kt * tk_t
        tile_end = tile_start + tk_t
        need = (tile_start < vls[0]) | (vls[0] == 0)
        full = tile_end <= vls[0]
        for j in range(1, bb):
            need = need | (tile_start < vls[j]) | (vls[j] == 0)
            full = full & (tile_end <= vls[j])
        # Fast path: every key in the tile is valid for every batch in the
        # block -> no per-element iota/compare/select at all.
        pl.when(need & full)(lambda: _compute(False, False))
        pl.when(need & jnp.logical_not(full))(lambda: _compute(True, bounds))
    else:
        if bounds:
            pl.when(kt != last_kt)(lambda: _compute(False, False))
            pl.when(kt == last_kt)(lambda: _compute(False, True))
        else:
            _compute(False, False)

    @pl.when(kt == last_kt)
    def _finalize():
        # EUP approximate reciprocal (~1e-4 rel err); fine for inference.
        inv_l = pl.reciprocal(l_sc[...], approx=True)
        o_ref[...] = (acc_sc[...] * inv_l).astype(o_ref.dtype)


# ---------------------------------------------------------------------------
# Wrapper
# ---------------------------------------------------------------------------

@functools.partial(jax.jit, static_argnames=("tq_cap", "tk_cap"))
def dot_product_attention(queries, keys, values, valid_lens=None, *,
                          tq_cap=512, tk_cap=1024):
    """Scaled dot-product attention with 1-D valid_lens masking (eval mode)."""
    B, Tq, D = queries.shape
    _, Tk, Dv = values.shape

    has_mask = valid_lens is not None
    if has_mask:
        vl = jnp.minimum(valid_lens.astype(jnp.int32), jnp.int32(Tk))
    else:
        vl = jnp.zeros((B,), jnp.int32)          # placeholder, unused

    itemsize = jnp.dtype(queries.dtype).itemsize
    tq_t, Tq_p, tk_t, Tk_p = _pick_tiles(Tq, Tk, D, Dv, itemsize,
                                         tq_cap, tk_cap)
    bb = _pick_batch_block(B, Tq_p, Tk_p, tq_t, tk_t, D, Dv, itemsize)

    pad_q, pad_k = Tq_p - Tq, Tk_p - Tk
    if pad_q:
        queries = jnp.pad(queries, ((0, 0), (0, pad_q), (0, 0)))
    if pad_k:
        keys = jnp.pad(keys, ((0, 0), (0, pad_k), (0, 0)))
        values = jnp.pad(values, ((0, 0), (0, pad_k), (0, 0)))

    n_k = Tk_p // tk_t
    grid = (B // bb, Tq_p // tq_t, n_k)

    def q_map(bi, qi, ki, vl_ref):
        return (bi, qi, 0)

    def o_map(bi, qi, ki, vl_ref):
        return (bi, qi, 0)

    if has_mask:
        # Clamp the key-tile index to the last tile holding any valid key for
        # this batch block: fully-masked (skipped) tiles re-reference an
        # already-fetched block, so no new HBM traffic is issued. Disabled
        # when any batch has valid_len == 0 (those rows attend uniformly over
        # every key, so every K/V tile must really be fetched).
        def kv_map(bi, qi, ki, vl_ref):
            b0 = bi * bb
            v0 = vl_ref[b0]
            last = jnp.maximum(
                lax.div(v0 + (tk_t - 1), jnp.int32(tk_t)) - 1, 0)
            any_zero = v0 == 0
            for j in range(1, bb):
                v = vl_ref[b0 + j]
                last = jnp.maximum(
                    last, lax.div(v + (tk_t - 1), jnp.int32(tk_t)) - 1)
                any_zero = any_zero | (v == 0)
            last = jnp.where(any_zero, n_k - 1, last)
            return (bi, jnp.minimum(ki, last), 0)
    else:
        def kv_map(bi, qi, ki, vl_ref):
            return (bi, ki, 0)

    grid_spec = pltpu.PrefetchScalarGridSpec(
        num_scalar_prefetch=1,                    # valid_lens -> SMEM
        grid=grid,
        in_specs=[
            pl.BlockSpec((bb, tq_t, D), q_map),
            pl.BlockSpec((bb, tk_t, D), kv_map),
            pl.BlockSpec((bb, tk_t, Dv), kv_map),
        ],
        out_specs=pl.BlockSpec((bb, tq_t, Dv), o_map),
        scratch_shapes=[
            pltpu.VMEM((bb, tq_t, 1), jnp.float32),       # running max
            pltpu.VMEM((bb, tq_t, 1), jnp.float32),       # running sum
            pltpu.VMEM((bb, tq_t, Dv), jnp.float32),      # f32 accumulator
            pltpu.VMEM((bb, tq_t, D), queries.dtype),     # pre-scaled Q
        ],
    )

    kernel = functools.partial(
        _sdpa_kernel, has_mask=has_mask, bb=bb,
        scale=1.0 / math.sqrt(D), k_valid=(Tk if pad_k else None))

    footprint = _vmem_footprint(bb, tq_t, tk_t, D, Dv, itemsize, itemsize)
    vmem_limit = int(min(48 * 1024 * 1024,
                         max(32 * 1024 * 1024, 2 * footprint)))

    out = pl.pallas_call(
        kernel,
        out_shape=jax.ShapeDtypeStruct((B, Tq_p, Dv), queries.dtype),
        grid_spec=grid_spec,
        compiler_params=pltpu.CompilerParams(
            dimension_semantics=("parallel", "parallel", "arbitrary"),
            vmem_limit_bytes=vmem_limit),
    )(vl, queries, keys, values)

    if pad_q:
        out = out[:, :Tq, :]
    return out


# ---------------------------------------------------------------------------
# Reference + demo
# ---------------------------------------------------------------------------

def _reference(queries, keys, values, valid_lens=None):
    """Pure-JAX reference mirroring the PyTorch module (eval mode)."""
    d = queries.shape[-1]
    scores = jnp.einsum("bqd,bkd->bqk", queries, keys) / math.sqrt(d)
    if valid_lens is not None:
        mask = (jnp.arange(scores.shape[-1])[None, None, :]
                < valid_lens[:, None, None])
        scores = jnp.where(mask, scores, -1.0e6)
    attn = jax.nn.softmax(scores, axis=-1)
    return jnp.einsum("bqk,bkv->bqv", attn, values)


if __name__ == "__main__":
    key = jax.random.PRNGKey(0)
    kq, kk, kv = jax.random.split(key, 3)

    B, Tq, Tk, D, Dv = 2, 8, 8, 32, 32
    queries = jax.random.normal(kq, (B, Tq, D), dtype=jnp.float32)
    keys = jax.random.normal(kk, (B, Tk, D), dtype=jnp.float32)
    values = jax.random.normal(kv, (B, Tk, Dv), dtype=jnp.float32)
    valid_lens = jnp.array([3, 6], dtype=jnp.int32)

    out = jax.block_until_ready(
        dot_product_attention(queries, keys, values, valid_lens))
    ref = _reference(queries, keys, values, valid_lens)
    assert out.shape == (B, Tq, Dv)
    # Tolerance covers the EUP approx reciprocal (~1e-4 relative).
    assert jnp.allclose(out, ref, atol=2e-3, rtol=2e-3), "mismatch (masked)"

    # valid_lens=None (no masking) path
    out2 = jax.block_until_ready(
        dot_product_attention(queries, keys, values, None))
    ref2 = _reference(queries, keys, values, None)
    assert jnp.allclose(out2, ref2, atol=2e-3, rtol=2e-3), "mismatch (no mask)"

    print("KERNEL_OK")
</pallas_src>

<mosaic_0001>
module attributes {stable_mosaic.version = 11 : i64} {
  func.func @_sdpa_kernel(%arg0: i32, %arg1: i32, %arg2: i32, %arg3: memref<2xi32, #tpu.memory_space<smem>>, %arg4: memref<1x8x32xf32, #tpu.memory_space<vmem>>, %arg5: memref<1x8x32xf32, #tpu.memory_space<vmem>>, %arg6: memref<1x8x32xf32, #tpu.memory_space<vmem>>, %arg7: memref<1x8x32xf32, #tpu.memory_space<vmem>>, %arg8: memref<1x8x1xf32, #tpu.memory_space<vmem>>, %arg9: memref<1x8x1xf32, #tpu.memory_space<vmem>>, %arg10: memref<1x8x32xf32, #tpu.memory_space<vmem>>, %arg11: memref<1x8x32xf32, #tpu.memory_space<vmem>>) attributes {dimension_semantics = [#tpu.dimension_semantics<parallel>, #tpu.dimension_semantics<parallel>, #tpu.dimension_semantics<arbitrary>], iteration_bounds = array<i64: 2, 1, 1>, scalar_prefetch = 1 : i64, scratch_operands = 4 : i64, tpu.core_type = #tpu.core_type<tc>, window_params = [{transform_indices = @transform_0, window_bounds = array<i64: 1, 8, 32>}, {transform_indices = @transform_1, window_bounds = array<i64: 1, 8, 32>}, {transform_indices = @transform_2, window_bounds = array<i64: 1, 8, 32>}, {transform_indices = @transform_3, window_bounds = array<i64: 1, 8, 32>}]} {
    %c0_i32 = arith.constant 0 : i32
    %0 = arith.cmpi eq, %arg2, %c0_i32 : i32
    %1 = arith.extui %0 : i1 to i32
    %c0_i32_0 = arith.constant 0 : i32
    %2 = arith.cmpi ne, %1, %c0_i32_0 : i32
    scf.if %2 {
      %cst = arith.constant 0xFF800000 : f32
      %23 = vector.broadcast %cst : f32 to vector<1x8x1xf32>
      %c0 = arith.constant 0 : index
      %c0_8 = arith.constant 0 : index
      %c0_9 = arith.constant 0 : index
      %24 = vector.load %arg8[%c0, %c0_8, %c0_9] : memref<1x8x1xf32, #tpu.memory_space<vmem>>, vector<1x8x1xf32>
      tpu.vector_store %arg8[%c0, %c0_8, %c0_9], %23 {strides = array<i32>} : memref<1x8x1xf32, #tpu.memory_space<vmem>>, vector<1x8x1xf32>,
      %cst_10 = arith.constant 0.000000e+00 : f32
      %25 = vector.broadcast %cst_10 : f32 to vector<1x8x1xf32>
      %c0_11 = arith.constant 0 : index
      %c0_12 = arith.constant 0 : index
      %c0_13 = arith.constant 0 : index
      %26 = vector.load %arg9[%c0_11, %c0_12, %c0_13] : memref<1x8x1xf32, #tpu.memory_space<vmem>>, vector<1x8x1xf32>
      tpu.vector_store %arg9[%c0_11, %c0_12, %c0_13], %25 {strides = array<i32>} : memref<1x8x1xf32, #tpu.memory_space<vmem>>, vector<1x8x1xf32>,
      %cst_14 = arith.constant 0.000000e+00 : f32
      %27 = vector.broadcast %cst_14 : f32 to vector<1x8x32xf32>
      %c0_15 = arith.constant 0 : index
      %c0_16 = arith.constant 0 : index
      %c0_17 = arith.constant 0 : index
      %28 = vector.load %arg10[%c0_15, %c0_16, %c0_17] : memref<1x8x32xf32, #tpu.memory_space<vmem>>, vector<1x8x32xf32>
      tpu.vector_store %arg10[%c0_15, %c0_16, %c0_17], %27 {strides = array<i32>} : memref<1x8x32xf32, #tpu.memory_space<vmem>>, vector<1x8x32xf32>,
      %c0_18 = arith.constant 0 : index
      %c0_19 = arith.constant 0 : index
      %c0_20 = arith.constant 0 : index
      %29 = vector.load %arg4[%c0_18, %c0_19, %c0_20] : memref<1x8x32xf32, #tpu.memory_space<vmem>>, vector<1x8x32xf32>
      %cst_21 = arith.constant 0.176776692 : f32
      %30 = vector.broadcast %cst_21 : f32 to vector<1x8x32xf32>
      %31 = arith.mulf %29, %30 : vector<1x8x32xf32>
      %c0_22 = arith.constant 0 : index
      %c0_23 = arith.constant 0 : index
      %c0_24 = arith.constant 0 : index
      %32 = vector.load %arg11[%c0_22, %c0_23, %c0_24] : memref<1x8x32xf32, #tpu.memory_space<vmem>>, vector<1x8x32xf32>
      tpu.vector_store %arg11[%c0_22, %c0_23, %c0_24], %31 {strides = array<i32>} : memref<1x8x32xf32, #tpu.memory_space<vmem>>, vector<1x8x32xf32>,
    } else {
    }
    %c1_i32 = arith.constant 1 : i32
    %3 = arith.muli %arg0, %c1_i32 : i32
    %c0_i32_1 = arith.constant 0 : i32
    %4 = arith.addi %3, %c0_i32_1 : i32
    %5 = arith.index_cast %4 : i32 to index
    %6 = memref.load %arg3[%5] : memref<2xi32, #tpu.memory_space<smem>>
    %c8_i32 = arith.constant 8 : i32
    %7 = arith.muli %arg2, %c8_i32 : i32
    %c8_i32_2 = arith.constant 8 : i32
    %8 = arith.addi %7, %c8_i32_2 : i32
    %9 = arith.cmpi slt, %7, %6 : i32
    %c0_i32_3 = arith.constant 0 : i32
    %10 = arith.cmpi eq, %6, %c0_i32_3 : i32
    %11 = arith.ori %9, %10 : i1
    %12 = arith.cmpi sle, %8, %6 : i32
    %13 = arith.andi %11, %12 : i1
    %14 = arith.extui %13 : i1 to i32
    %c0_i32_4 = arith.constant 0 : i32
    %15 = arith.cmpi ne, %14, %c0_i32_4 : i32
    scf.if %15 {
      %c0 = arith.constant 0 : index
      %c0_8 = arith.constant 0 : index
      %c0_9 = arith.constant 0 : index
      %23 = vector.load %arg11[%c0, %c0_8, %c0_9] : memref<1x8x32xf32, #tpu.memory_space<vmem>>, vector<1x8x32xf32>
      %c0_10 = arith.constant 0 : index
      %c0_11 = arith.constant 0 : index
      %c0_12 = arith.constant 0 : index
      %24 = vector.load %arg5[%c0_10, %c0_11, %c0_12] : memref<1x8x32xf32, #tpu.memory_space<vmem>>, vector<1x8x32xf32>
      "tpu.trace_start"() <{level = 10 : i32, message = "bqd,bkd->bqk"}> : () -> ()
      %cst = arith.constant dense<0.000000e+00> : vector<1x8x8xf32>
      %25 = tpu.matmul %23, %24, %cst {dimension_numbers = #tpu.dot_dimension_numbers<[2], [2], [1], [1], [0, 0, 0, 1, 1, 1], [0], [0]>} : vector<1x8x32xf32>, vector<1x8x32xf32>, vector<1x8x8xf32> -> vector<1x8x8xf32>
      "tpu.trace_stop"() : () -> ()
      %c0_13 = arith.constant 0 : index
      %c0_14 = arith.constant 0 : index
      %c0_15 = arith.constant 0 : index
      %26 = vector.load %arg8[%c0_13, %c0_14, %c0_15] : memref<1x8x1xf32, #tpu.memory_space<vmem>>, vector<1x8x1xf32>
      %cst_16 = arith.constant dense<0xFF800000> : vector<1x8xf32>
      %27 = vector.multi_reduction <maximumf>, %25, %cst_16 [2] : vector<1x8x8xf32> to vector<1x8xf32>
      %28 = vector.shape_cast %27 : vector<1x8xf32> to vector<1x8x1xf32>
      %29 = arith.maximumf %26, %28 : vector<1x8x1xf32>
      %c0_17 = arith.constant 0 : index
      %c0_18 = arith.constant 0 : index
      %c0_19 = arith.constant 0 : index
      %30 = vector.load %arg8[%c0_17, %c0_18, %c0_19] : memref<1x8x1xf32, #tpu.memory_space<vmem>>, vector<1x8x1xf32>
      %31 = arith.subf %30, %29 : vector<1x8x1xf32>
      %32 = math.exp %31 : vector<1x8x1xf32>
      %33 = vector.broadcast %29 : vector<1x8x1xf32> to vector<1x8x8xf32>
      %34 = arith.subf %25, %33 : vector<1x8x8xf32>
      %35 = math.exp %34 : vector<1x8x8xf32>
      %c0_20 = arith.constant 0 : index
      %c0_21 = arith.constant 0 : index
      %c0_22 = arith.constant 0 : index
      %36 = vector.load %arg9[%c0_20, %c0_21, %c0_22] : memref<1x8x1xf32, #tpu.memory_space<vmem>>, vector<1x8x1xf32>
      %37 = arith.mulf %32, %36 : vector<1x8x1xf32>
      %cst_23 = arith.constant dense<0.000000e+00> : vector<1x8xf32>
      %38 = vector.multi_reduction <add>, %35, %cst_23 [2] : vector<1x8x8xf32> to vector<1x8xf32>
      %39 = vector.shape_cast %38 : vector<1x8xf32> to vector<1x8x1xf32>
      %40 = arith.addf %37, %39 : vector<1x8x1xf32>
      %c0_24 = arith.constant 0 : index
      %c0_25 = arith.constant 0 : index
      %c0_26 = arith.constant 0 : index
      %41 = vector.load %arg9[%c0_24, %c0_25, %c0_26] : memref<1x8x1xf32, #tpu.memory_space<vmem>>, vector<1x8x1xf32>
      tpu.vector_store %arg9[%c0_24, %c0_25, %c0_26], %40 {strides = array<i32>} : memref<1x8x1xf32, #tpu.memory_space<vmem>>, vector<1x8x1xf32>,
      %c0_27 = arith.constant 0 : index
      %c0_28 = arith.constant 0 : index
      %c0_29 = arith.constant 0 : index
      %42 = vector.load %arg6[%c0_27, %c0_28, %c0_29] : memref<1x8x32xf32, #tpu.memory_space<vmem>>, vector<1x8x32xf32>
      "tpu.trace_start"() <{level = 10 : i32, message = "bqk,bkv->bqv"}> : () -> ()
      %cst_30 = arith.constant dense<0.000000e+00> : vector<1x8x32xf32>
      %43 = tpu.matmul %35, %42, %cst_30 {dimension_numbers = #tpu.dot_dimension_numbers<[2], [1], [1], [2], [0, 0, 0, 1, 1, 2], [0], [0]>} : vector<1x8x8xf32>, vector<1x8x32xf32>, vector<1x8x32xf32> -> vector<1x8x32xf32>
      "tpu.trace_stop"() : () -> ()
      %c0_31 = arith.constant 0 : index
      %c0_32 = arith.constant 0 : index
      %c0_33 = arith.constant 0 : index
      %44 = vector.load %arg10[%c0_31, %c0_32, %c0_33] : memref<1x8x32xf32, #tpu.memory_space<vmem>>, vector<1x8x32xf32>
      %45 = vector.broadcast %32 : vector<1x8x1xf32> to vector<1x8x32xf32>
      %46 = arith.mulf %45, %44 : vector<1x8x32xf32>
      %47 = arith.addf %46, %43 : vector<1x8x32xf32>
      %c0_34 = arith.constant 0 : index
      %c0_35 = arith.constant 0 : index
      %c0_36 = arith.constant 0 : index
      %48 = vector.load %arg10[%c0_34, %c0_35, %c0_36] : memref<1x8x32xf32, #tpu.memory_space<vmem>>, vector<1x8x32xf32>
      tpu.vector_store %arg10[%c0_34, %c0_35, %c0_36], %47 {strides = array<i32>} : memref<1x8x32xf32, #tpu.memory_space<vmem>>, vector<1x8x32xf32>,
      %c0_37 = arith.constant 0 : index
      %c0_38 = arith.constant 0 : index
      %c0_39 = arith.constant 0 : index
      %49 = vector.load %arg8[%c0_37, %c0_38, %c0_39] : memref<1x8x1xf32, #tpu.memory_space<vmem>>, vector<1x8x1xf32>
      tpu.vector_store %arg8[%c0_37, %c0_38, %c0_39], %29 {strides = array<i32>} : memref<1x8x1xf32, #tpu.memory_space<vmem>>, vector<1x8x1xf32>,
    } else {
    }
    %true = arith.constant true
    %16 = arith.xori %12, %true : i1
    %17 = arith.andi %11, %16 : i1
    %18 = arith.extui %17 : i1 to i32
    %c0_i32_5 = arith.constant 0 : i32
    %19 = arith.cmpi ne, %18, %c0_i32_5 : i32
    scf.if %19 {
      %c0 = arith.constant 0 : index
      %c0_8 = arith.constant 0 : index
      %c0_9 = arith.constant 0 : index
      %23 = vector.load %arg11[%c0, %c0_8, %c0_9] : memref<1x8x32xf32, #tpu.memory_space<vmem>>, vector<1x8x32xf32>
      %c0_10 = arith.constant 0 : index
      %c0_11 = arith.constant 0 : index
      %c0_12 = arith.constant 0 : index
      %24 = vector.load %arg5[%c0_10, %c0_11, %c0_12] : memref<1x8x32xf32, #tpu.memory_space<vmem>>, vector<1x8x32xf32>
      "tpu.trace_start"() <{level = 10 : i32, message = "bqd,bkd->bqk"}> : () -> ()
      %cst = arith.constant dense<0.000000e+00> : vector<1x8x8xf32>
      %25 = tpu.matmul %23, %24, %cst {dimension_numbers = #tpu.dot_dimension_numbers<[2], [2], [1], [1], [0, 0, 0, 1, 1, 1], [0], [0]>} : vector<1x8x32xf32>, vector<1x8x32xf32>, vector<1x8x8xf32> -> vector<1x8x8xf32>
      "tpu.trace_stop"() : () -> ()
      %26 = tpu.iota {dimensions = array<i32: 2>} : vector<1x8x8xi32>
      %c8_i32_13 = arith.constant 8 : i32
      %27 = arith.muli %arg2, %c8_i32_13 : i32
      %28 = vector.broadcast %27 : i32 to vector<1x8x8xi32>
      %29 = arith.addi %26, %28 : vector<1x8x8xi32>
      %30 = tpu.iota {dimensions = array<i32: 0>} : vector<1x1x1xi32>
      %c0_i32_14 = arith.constant 0 : i32
      %31 = vector.broadcast %c0_i32_14 : i32 to vector<1x1x1xi32>
      %c0_i32_15 = arith.constant 0 : i32
      %32 = vector.broadcast %c0_i32_15 : i32 to vector<1x1x1xi32>
      %33 = arith.cmpi eq, %30, %32 : vector<1x1x1xi32>
      %34 = vector.broadcast %6 : i32 to vector<1x1x1xi32>
      %35 = arith.select %33, %34, %31 : vector<1x1x1xi1>, vector<1x1x1xi32>
      %36 = vector.broadcast %35 : vector<1x1x1xi32> to vector<1x8x8xi32>
      %37 = arith.cmpi slt, %29, %36 : vector<1x8x8xi32>
      %cst_16 = arith.constant -1.000000e+06 : f32
      %38 = vector.broadcast %cst_16 : f32 to vector<1x8x8xf32>
      %39 = arith.select %37, %25, %38 : vector<1x8x8xi1>, vector<1x8x8xf32>
      %c0_17 = arith.constant 0 : index
      %c0_18 = arith.constant 0 : index
      %c0_19 = arith.constant 0 : index
      %40 = vector.load %arg8[%c0_17, %c0_18, %c0_19] : memref<1x8x1xf32, #tpu.memory_space<vmem>>, vector<1x8x1xf32>
      %cst_20 = arith.constant dense<0xFF800000> : vector<1x8xf32>
      %41 = vector.multi_reduction <maximumf>, %39, %cst_20 [2] : vector<1x8x8xf32> to vector<1x8xf32>
      %42 = vector.shape_cast %41 : vector<1x8xf32> to vector<1x8x1xf32>
      %43 = arith.maximumf %40, %42 : vector<1x8x1xf32>
      %c0_21 = arith.constant 0 : index
      %c0_22 = arith.constant 0 : index
      %c0_23 = arith.constant 0 : index
      %44 = vector.load %arg8[%c0_21, %c0_22, %c0_23] : memref<1x8x1xf32, #tpu.memory_space<vmem>>, vector<1x8x1xf32>
      %45 = arith.subf %44, %43 : vector<1x8x1xf32>
      %46 = math.exp %45 : vector<1x8x1xf32>
      %47 = vector.broadcast %43 : vector<1x8x1xf32> to vector<1x8x8xf32>
      %48 = arith.subf %39, %47 : vector<1x8x8xf32>
      %49 = math.exp %48 : vector<1x8x8xf32>
      %c0_24 = arith.constant 0 : index
      %c0_25 = arith.constant 0 : index
      %c0_26 = arith.constant 0 : index
      %50 = vector.load %arg9[%c0_24, %c0_25, %c0_26] : memref<1x8x1xf32, #tpu.memory_space<vmem>>, vector<1x8x1xf32>
      %51 = arith.mulf %46, %50 : vector<1x8x1xf32>
      %cst_27 = arith.constant dense<0.000000e+00> : vector<1x8xf32>
      %52 = vector.multi_reduction <add>, %49, %cst_27 [2] : vector<1x8x8xf32> to vector<1x8xf32>
      %53 = vector.shape_cast %52 : vector<1x8xf32> to vector<1x8x1xf32>
      %54 = arith.addf %51, %53 : vector<1x8x1xf32>
      %c0_28 = arith.constant 0 : index
      %c0_29 = arith.constant 0 : index
      %c0_30 = arith.constant 0 : index
      %55 = vector.load %arg9[%c0_28, %c0_29, %c0_30] : memref<1x8x1xf32, #tpu.memory_space<vmem>>, vector<1x8x1xf32>
      tpu.vector_store %arg9[%c0_28, %c0_29, %c0_30], %54 {strides = array<i32>} : memref<1x8x1xf32, #tpu.memory_space<vmem>>, vector<1x8x1xf32>,
      %c0_31 = arith.constant 0 : index
      %c0_32 = arith.constant 0 : index
      %c0_33 = arith.constant 0 : index
      %56 = vector.load %arg6[%c0_31, %c0_32, %c0_33] : memref<1x8x32xf32, #tpu.memory_space<vmem>>, vector<1x8x32xf32>
      "tpu.trace_start"() <{level = 10 : i32, message = "bqk,bkv->bqv"}> : () -> ()
      %cst_34 = arith.constant dense<0.000000e+00> : vector<1x8x32xf32>
      %57 = tpu.matmul %49, %56, %cst_34 {dimension_numbers = #tpu.dot_dimension_numbers<[2], [1], [1], [2], [0, 0, 0, 1, 1, 2], [0], [0]>} : vector<1x8x8xf32>, vector<1x8x32xf32>, vector<1x8x32xf32> -> vector<1x8x32xf32>
      "tpu.trace_stop"() : () -> ()
      %c0_35 = arith.constant 0 : index
      %c0_36 = arith.constant 0 : index
      %c0_37 = arith.constant 0 : index
      %58 = vector.load %arg10[%c0_35, %c0_36, %c0_37] : memref<1x8x32xf32, #tpu.memory_space<vmem>>, vector<1x8x32xf32>
      %59 = vector.broadcast %46 : vector<1x8x1xf32> to vector<1x8x32xf32>
      %60 = arith.mulf %59, %58 : vector<1x8x32xf32>
      %61 = arith.addf %60, %57 : vector<1x8x32xf32>
      %c0_38 = arith.constant 0 : index
      %c0_39 = arith.constant 0 : index
      %c0_40 = arith.constant 0 : index
      %62 = vector.load %arg10[%c0_38, %c0_39, %c0_40] : memref<1x8x32xf32, #tpu.memory_space<vmem>>, vector<1x8x32xf32>
      tpu.vector_store %arg10[%c0_38, %c0_39, %c0_40], %61 {strides = array<i32>} : memref<1x8x32xf32, #tpu.memory_space<vmem>>, vector<1x8x32xf32>,
      %c0_41 = arith.constant 0 : index
      %c0_42 = arith.constant 0 : index
      %c0_43 = arith.constant 0 : index
      %63 = vector.load %arg8[%c0_41, %c0_42, %c0_43] : memref<1x8x1xf32, #tpu.memory_space<vmem>>, vector<1x8x1xf32>
      tpu.vector_store %arg8[%c0_41, %c0_42, %c0_43], %43 {strides = array<i32>} : memref<1x8x1xf32, #tpu.memory_space<vmem>>, vector<1x8x1xf32>,
    } else {
    }
    %c0_i32_6 = arith.constant 0 : i32
    %20 = arith.cmpi eq, %arg2, %c0_i32_6 : i32
    %21 = arith.extui %20 : i1 to i32
    %c0_i32_7 = arith.constant 0 : i32
    %22 = arith.cmpi ne, %21, %c0_i32_7 : i32
    scf.if %22 {
      %c0 = arith.constant 0 : index
      %c0_8 = arith.constant 0 : index
      %c0_9 = arith.constant 0 : index
      %23 = vector.load %arg9[%c0, %c0_8, %c0_9] : memref<1x8x1xf32, #tpu.memory_space<vmem>>, vector<1x8x1xf32>
      %24 = tpu.reciprocal %23 {approx = true} : vector<1x8x1xf32> -> vector<1x8x1xf32>
      %c0_10 = arith.constant 0 : index
      %c0_11 = arith.constant 0 : index
      %c0_12 = arith.constant 0 : index
      %25 = vector.load %arg10[%c0_10, %c0_11, %c0_12] : memref<1x8x32xf32, #tpu.memory_space<vmem>>, vector<1x8x32xf32>
      %26 = vector.broadcast %24 : vector<1x8x1xf32> to vector<1x8x32xf32>
      %27 = arith.mulf %25, %26 : vector<1x8x32xf32>
      %c0_13 = arith.constant 0 : index
      %c0_14 = arith.constant 0 : index
      %c0_15 = arith.constant 0 : index
      %28 = vector.load %arg7[%c0_13, %c0_14, %c0_15] : memref<1x8x32xf32, #tpu.memory_space<vmem>>, vector<1x8x32xf32>
      tpu.vector_store %arg7[%c0_13, %c0_14, %c0_15], %27 {strides = array<i32>} : memref<1x8x32xf32, #tpu.memory_space<vmem>>, vector<1x8x32xf32>,
    } else {
    }
    return
  }
  func.func @transform_0(%arg0: i32, %arg1: i32, %arg2: i32, %arg3: memref<2xi32, #tpu.memory_space<smem>>) -> (i32, i32, i32) {
    %c0_i32 = arith.constant 0 : i32
    %c0_i32_0 = arith.constant 0 : i32
    return %arg0, %arg1, %c0_i32 : i32, i32, i32
  }
  func.func @transform_1(%arg0: i32, %arg1: i32, %arg2: i32, %arg3: memref<2xi32, #tpu.memory_space<smem>>) -> (i32, i32, i32) {
    %c1_i32 = arith.constant 1 : i32
    %0 = arith.muli %arg0, %c1_i32 : i32
    %1 = arith.index_cast %0 : i32 to index
    %2 = memref.load %arg3[%1] : memref<2xi32, #tpu.memory_space<smem>>
    %c7_i32 = arith.constant 7 : i32
    %3 = arith.addi %2, %c7_i32 : i32
    %c8_i32 = arith.constant 8 : i32
    %4 = arith.divsi %3, %c8_i32 : i32
    %c1_i32_0 = arith.constant 1 : i32
    %5 = arith.subi %4, %c1_i32_0 : i32
    %c0_i32 = arith.constant 0 : i32
    %6 = arith.maxsi %5, %c0_i32 : i32
    %c0_i32_1 = arith.constant 0 : i32
    %7 = arith.cmpi eq, %2, %c0_i32_1 : i32
    %c0_i32_2 = arith.constant 0 : i32
    %8 = arith.select %7, %c0_i32_2, %6 : i32
    %9 = arith.minsi %arg2, %8 : i32
    %c0_i32_3 = arith.constant 0 : i32
    %c0_i32_4 = arith.constant 0 : i32
    return %arg0, %9, %c0_i32_3 : i32, i32, i32
  }
  func.func @transform_2(%arg0: i32, %arg1: i32, %arg2: i32, %arg3: memref<2xi32, #tpu.memory_space<smem>>) -> (i32, i32, i32) {
    %c1_i32 = arith.constant 1 : i32
    %0 = arith.muli %arg0, %c1_i32 : i32
    %1 = arith.index_cast %0 : i32 to index
    %2 = memref.load %arg3[%1] : memref<2xi32, #tpu.memory_space<smem>>
    %c7_i32 = arith.constant 7 : i32
    %3 = arith.addi %2, %c7_i32 : i32
    %c8_i32 = arith.constant 8 : i32
    %4 = arith.divsi %3, %c8_i32 : i32
    %c1_i32_0 = arith.constant 1 : i32
    %5 = arith.subi %4, %c1_i32_0 : i32
    %c0_i32 = arith.constant 0 : i32
    %6 = arith.maxsi %5, %c0_i32 : i32
    %c0_i32_1 = arith.constant 0 : i32
    %7 = arith.cmpi eq, %2, %c0_i32_1 : i32
    %c0_i32_2 = arith.constant 0 : i32
    %8 = arith.select %7, %c0_i32_2, %6 : i32
    %9 = arith.minsi %arg2, %8 : i32
    %c0_i32_3 = arith.constant 0 : i32
    %c0_i32_4 = arith.constant 0 : i32
    return %arg0, %9, %c0_i32_3 : i32, i32, i32
  }
  func.func @transform_3(%arg0: i32, %arg1: i32, %arg2: i32, %arg3: memref<2xi32, #tpu.memory_space<smem>>) -> (i32, i32, i32) {
    %c0_i32 = arith.constant 0 : i32
    %c0_i32_0 = arith.constant 0 : i32
    return %arg0, %arg1, %c0_i32 : i32, i32, i32
  }
}

</mosaic_0001>

<bundles_post_ra>
// kernel: dot_product_attention.1
= control target key start
LH: loop header
LB: loop body
LE: loop exit
PB: predicated region body
PF: predicated region fallthrough
CT: control target
= control target key end

     0   :  { %s1231_s18 = smov [#allocation7]   ;;  %s1650_s0 = inlined_call_operand.vmem [shape: s32[2], index: 0, kind: input, shape index: {}]   ;;  %s1651_s1 = inlined_call_operand.hbm [shape: f32[2,8,32], index: 1, kind: input, shape index: {}]   ;;  %s1652_s2 = inlined_call_operand.hbm [shape: f32[2,8,32], index: 2, kind: input, shape index: {}]   ;;  %s1653_s3 = inlined_call_operand.hbm [shape: f32[2,8,32], index: 3, kind: input, shape index: {}]   ;;  %s1654_s4 = inlined_call_operand.hbm [shape: f32[2,8,32], index: 4, kind: output, shape index: {}]  }
   0x1   :  { %1663 = sst [smem:[#allocation30_spill]] %s1651_s1  ;;  %s10_s17 = sshll.u32 %s1650_s0, 4  ;;  %s11_s17 = int_to_ptr.vmem [resolvable:$true] %s10_s17 }
   0x2   :  { %1664 = sst [smem:[#allocation31_spill]] %s1652_s2 }
   0x3   :  { %1665 = sst [smem:[#allocation32_spill]] %s1653_s3 }
   0x4   :  { %1666 = sst [smem:[#allocation33_spill]] %s1654_s4 }
   0x5   :  { %13 = dma.vmem_to_smem %s11_s17, 16, %s1231_s18, [#allocation6] }
   0x6   :  { %1165 = dma.done.wait [#allocation6], 16 }
   0x7   :  { %1166 = vsyncadd [#allocation6], 4294967280 }
   0x8   :  { %16 = sfence }
   0x9   :  { %17 = vsyncpa [#allocation9], 0 }
   0xa   :  { %19 = vsyncpa [#allocation9 + $0x1], 0 }
   0xb   :  { %20 = vsyncpa [#allocation12], 0 }
   0xc   :  { %22 = vsyncpa [#allocation12 + $0x1], 0 }
   0xd   :  { %23 = vsyncpa [#allocation10], 0 }
   0xe   :  { %25 = vsyncpa [#allocation10 + $0x1], 0  ;;  %s1265_s19 = smov 0   ;;  %s1267_s20 = smov 0  }
   0xf   :  { %s1269_s21 = smov 0   ;;  %s1271_s22 = smov 0  }
  0x10   :  { %s1273_s0 = smov 0   ;;  %s1275_s23 = smov 0  }
  0x11   :  { %s1277_s24 = smov 0   ;;  %s1279_s25 = smov 0  }
  0x12   :  { %s1281_s26 = smov 0   ;;  %s1283_s27 = smov 0  }
  0x13   :  { %s1285_s28 = smov 0   ;;  %s1287_s29 = smov 0  }
  0x14 LB: > { %1667 = sst [smem:[#allocation24_spill]] %s1217_s26  ;;  %p1658_p0 = scmp.eq.s32.totalorder %s1229_s29, 0  ;;  %s1229_s29 = sphi %s1287_s29, %s31_s29   ;;  %s1225_s28 = sphi %s1285_s28, %s1714_s28   ;;  %s1221_s27 = sphi %s1283_s27, %s1713_s27   ;;  %s1217_s26 = sphi %s1281_s26, %s1703_s26   ;;  %s1213_s25 = sphi %s1279_s25, %s1712_s25   ;;  %s1209_s24 = sphi %s1277_s24, %s1711_s24   ;;  %s1205_s23 = sphi %s1275_s23, %s1710_s23   ;;  %s1201_s0 = sphi %s1273_s0, %s1709_s0   ;;  %s1197_s22 = sphi %s1271_s22, %s1708_s22   ;;  %s1193_s21 = sphi %s1269_s21, %s1707_s21   ;;  %s1189_s20 = sphi %s1267_s20, %s1706_s20   ;;  %s1185_s19 = sphi %s1265_s19, %s1705_s19  }
  0x15   : > { %1668 = sst [smem:[#allocation25_spill]] %s1221_s27  ;;  %p124_p1 = scmp.ne.s32.totalorder %s1205_s23, %s1201_s0 }
  0x16   : > { %p1659_p3 = scmp.lt.s32.totalorder %s1229_s29, 2  ;;  %s262_s5 = sand.u32 1, %s1205_s23  }
  0x17   : > { %p126_p2 = por %p124_p1, %p1658_p0  ;;  %s810_s6 = sshll.u32 %s262_s5, 3 }
  0x18   : > { %s264_s10 = scalar_lea.vmem [#allocation11], %s810_s6  ;;  %s50_s5 = sadd.s32 1, %s1225_s28 }
  0x19   : > { %p1335_p4 = pnand %p1659_p3, %p126_p2  ;;  %s1344_s11 = sshll.u32 %s264_s10, 4  ;;  %s289_s11 = int_to_ptr.vmem [resolvable:$true] %s1344_s11 }
  0x1a   : > { %s839_s8 = scalar_select %p126_p2, [#allocation7], [#allocation15] }
  0x1b   : > { %s840_s9 = scalar_select %p126_p2, %s1225_s28, 0 }
  0x1c   : > { %s1716_s8 = smov (!%p1659_p3, %s839_s8), [#allocation17]  ;;  %s1349_s6 = sadd.s32 4294967295, %s1229_s29  }
  0x1d   : > { %s1718_s9 = smov (!%p1659_p3, %s840_s9), 0  ;;  %p52_p8 = scmp.ge.s32.totalorder %s50_s5, 2 }
  0x1e   : > { %s265_s12 = sld [smem:[%s1716_s8 + %s1718_s9]]  ;;  %s59_s9 = sadd.s32 1, %s1217_s26 }
  0x1f   : > { %s1724_s5 = smov (%p52_p8, %s50_s5), 0  ;;  %p66_p11 = scmp.ne.s32.totalorder %s1217_s26, %s1213_s25 }
  0x20   : > { %1670 = sst [smem:[#allocation26_spill]] %s1724_s5  ;;  %s1355_s8 = ssub.s32 %s1225_s28, %s1724_s5 }
  0x21   : > { %p57_p10 = scmp.eq.s32.totalorder %s1355_s8, 0  ;;  %p72_p12 = scmp.ne.s32.totalorder %s1213_s25, %s1209_s24 }
  0x22   : > { %p73_p13 = scmp.eq.s32.totalorder %s1349_s6, 0  ;;  %s1672_s2 = sld [smem:[#allocation31_spill]] }
  0x23   : > { %s1364_s10 = scalar_select %p57_p10, %s1217_s26, %s59_s9  }
  0x24   : > { %s266_s13 = sadd.s32 7, %s265_s12  ;;  %p276_p6 = scmp.eq.s32.totalorder %s265_s12, 0 }
  0x25   : > { %p267_p5 = scmp.lt.s32.totalorder %s266_s13, 0  ;;  %s268_s14 = ssub.s32 0, %s266_s13 }
  0x26   : > { %s811_s15 = smin.u32 %s268_s14, %s266_s13  ;;  %1671 = sst [smem:[#allocation27_spill]] %s1364_s10 }
  0x27   : > { %s270_s16 = sshrl.u32 %s811_s15, 3  ;;  %s1369_s14 = sld [smem:[#allocation7 + %s1225_s28]] }
  0x28   : > { %s271_s17 = ssub.s32 0, %s270_s16  ;;  %p1379_p1 = por %p73_p13, %p72_p12 }
  0x29   : > { %s1720_s17 = smov (!%p267_p5, %s271_s17), %s270_s16  ;;  %s1384_s9 = sld [smem:[#allocation7 + %s1724_s5]] }
  0x2a   : > { %s812_s18 = sadd.s32 4294967295, %s1720_s17  ;;  %p1401_p2 = por %p1658_p0, %p66_p11 }
  0x2b   : > { %p274_p7 = scmp.gt.s32.totalorder %s812_s18, 0  ;;  %p130_p5 = scmp.ne.s32.totalorder %s1201_s0, %s1197_s22 }
  0x2c   : > { %s1673_s30 = scalar_select %p1379_p1, 1, 0 }
  0x2d   : > { %s1722_s18 = smov (!%p274_p7, %s812_s18), 0  ;;  %s83_s15 = sadd.s32 7, %s1369_s14 }
  0x2e   : > { %s1726_s18 = smov (%p276_p6, %s1722_s18), 0  ;;  %1674 = sst [smem:[#allocation28_spill]] %s1673_s30 }
  0x2f   : > { %p813_p9 = scmp.gt.s32.totalorder %s1726_s18, 0  ;;  %s1409_s16 = sld [smem:[#allocation7 + %s1225_s28]] }
  0x30   : > { %p84_p6 = scmp.lt.s32.totalorder %s83_s15, 0  ;;  %s98_s7 = sadd.s32 7, %s1384_s9 }
  0x31   : > { %s1728_s18 = smov (%p813_p9, %s1726_s18), 0  ;;  %p99_p7 = scmp.lt.s32.totalorder %s98_s7, 0 }
  0x32   : > { %s282_s12 = sadd.s32 %s1225_s28, %s1728_s18  ;;  %p1418_p9 = por %p130_p5, %p73_p13 }
  0x33   : > { %s814_s13 = sshll.u32 %s282_s12, 3  ;;  %s1675_s12 = sand.u32 1, %s1229_s29  }
  0x34   : > { %s284_s17 = scalar_lea.hbm %s1672_s2, %s814_s13  ;;  %s1389_s10 = scalar_lea.sflag [#allocation12], %s1675_s12 }
  0x35   : > { %s286_s4 = sshll.u32 %s284_s17, 4  ;;  %s85_s17 = ssub.s32 0, %s83_s15  ;;  %s287_s4 = int_to_ptr.hbm [resolvable:$true] %s286_s4 }
  0x36   : > { %858 = dma.hbm_to_vmem [thread:$0]  (!%p1335_p4), %s287_s4, 128, %s289_s11, %s1389_s10  }
  0x37   : > { %s794_s18 = smin.u32 %s85_s17, %s83_s15  ;;  %s100_s11 = ssub.s32 0, %s98_s7 }
  0x38   : > { %s87_s12 = sshrl.u32 %s794_s18, 3  ;;  %p93_p4 = scmp.eq.s32.totalorder %s1369_s14, 0 }
  0x39   : > { %s88_s4 = ssub.s32 0, %s87_s12  ;;  %s797_s2 = smin.u32 %s100_s11, %s98_s7 }
  0x3a   : > { %s1730_s4 = smov (!%p84_p6, %s88_s4), %s87_s12  ;;  %s102_s30 = sshrl.u32 %s797_s2, 3 }
  0x3b   : > { %s795_s27 = sadd.s32 4294967295, %s1730_s4  ;;  %s103_s3 = ssub.s32 0, %s102_s30 }
  0x3c   : > { %p91_p8 = scmp.gt.s32.totalorder %s795_s27, 0  ;;  %s1732_s3 = smov (!%p99_p7, %s103_s3), %s102_s30 }
  0x3d   : > { %s798_s15 = sadd.s32 4294967295, %s1732_s3  ;;  %p108_p6 = scmp.eq.s32.totalorder %s1384_s9, 0 }
  0x3e   : > { %s1734_s27 = smov (!%p91_p8, %s795_s27), 0  ;;  %p106_p10 = scmp.gt.s32.totalorder %s798_s15, 0 }
  0x3f   : > { %s1736_s27 = smov (%p93_p4, %s1734_s27), 0  ;;  %s141_s14 = sadd.s32 7, %s1409_s16 }
  0x40   : > { %p796_p0 = scmp.gt.s32.totalorder %s1736_s27, 0  ;;  %s1738_s15 = smov (!%p106_p10, %s798_s15), 0 }
  0x41   : > { %s1742_s15 = smov (%p108_p6, %s1738_s15), 0  ;;  %s117_s2 = sadd.s32 1, %s1205_s23 }
  0x42   : > { %s1740_s27 = smov (%p796_p0, %s1736_s27), 0  ;;  %s143_s3 = ssub.s32 0, %s141_s14 }
  0x43   : > { %p799_p5 = scmp.gt.s32.totalorder %s1742_s15, 0  ;;  %s800_s22 = smin.u32 %s143_s3, %s141_s14 }
  0x44   : > { %s145_s30 = sshrl.u32 %s800_s22, 3  ;;  %s1426_s17 = sld [smem:[#allocation7 + %s1724_s5]] }
  0x45   : > { %s1744_s15 = smov (%p799_p5, %s1742_s15), 0  ;;  %p142_p7 = scmp.lt.s32.totalorder %s141_s14, 0 }
  0x46   : > { %p151_p4 = scmp.eq.s32.totalorder %s1409_s16, 0  ;;  %s113_s9 = ssub.s32 %s1740_s27, %s1744_s15 }
  0x47   : > { %s146_s7 = ssub.s32 0, %s145_s30  ;;  %s114_s12 = sor.u32 %s113_s9, %s1355_s8 }
  0x48   : > { %p115_p0 = scmp.eq.s32.totalorder %s114_s12, 0  ;;  %p188_p8 = scmp.ne.s32.totalorder %s1189_s20, %s1185_s19 }
  0x49   : > { %s1746_s7 = smov (!%p142_p7, %s146_s7), %s145_s30  ;;  %p214_p7 = scmp.eq.s32.totalorder %s1349_s6, 1 }
  0x4a   : > { %s1434_s11 = scalar_select %p115_p0, %s1205_s23, %s117_s2  }
  0x4b   : > { %s801_s3 = sadd.s32 4294967295, %s1746_s7  ;;  %s156_s22 = sadd.s32 7, %s1426_s17 }
  0x4c   : > { %1678 = sst [smem:[#allocation29_spill]] %s1434_s11  ;;  %p149_p10 = scmp.gt.s32.totalorder %s801_s3, 0 }
  0x4d   : > { %p157_p6 = scmp.lt.s32.totalorder %s156_s22, 0  ;;  %s158_s14 = ssub.s32 0, %s156_s22 }
  0x4e   : > { %s1748_s3 = smov (!%p149_p10, %s801_s3), 0  ;;  %s803_s27 = smin.u32 %s158_s14, %s156_s22 }
  0x4f   : > { %p1440_p3 = por %p188_p8, %p73_p13  ;;  %s1750_s3 = smov (%p151_p4, %s1748_s3), 0 }
  0x50   : > { %s160_s15 = sshrl.u32 %s803_s27, 3  ;;  %p802_p0 = scmp.gt.s32.totalorder %s1750_s3, 0 }
  0x51   : > { %s1679_s19 = scalar_select %p1440_p3, 1, 0 }
  0x52   : > { %s161_s2 = ssub.s32 0, %s160_s15  ;;  %s1754_s3 = smov (%p802_p0, %s1750_s3), 0 }
  0x53   : > { %s1752_s2 = smov (!%p157_p6, %s161_s2), %s160_s15  ;;  %p1450_p10 = por %p214_p7, %p66_p11 }
  0x54   : > { %s804_s30 = sadd.s32 4294967295, %s1752_s2  ;;  %s1681_s7 = sadd.s32 4294967294, %s1229_s29  }
  0x55   : > { %p164_p13 = scmp.gt.s32.totalorder %s804_s30, 0  ;;  %p220_p8 = scmp.eq.s32.totalorder %s1681_s7, 1 }
  0x56   : > { %s240_s16 = sand.u32 1, %s1217_s26   ;;  %p182_p4 = scmp.ne.s32.totalorder %s1193_s21, %s1189_s20 }
  0x57   : > { %s1756_s30 = smov (!%p164_p13, %s804_s30), 0  ;;  %p1463_p3 = por %p220_p8, %p72_p12 }
  0x58   : > { %p1683_p6 = scmp.eq.s32.totalorder %s1426_s17, 0  ;;  %s808_s22 = sshll.u32 %s240_s16, 3 }
  0x59   : > { %s809_s14 = sshll.u32 %s1225_s28, 3  ;;  %s1684_s1 = sld [smem:[#allocation30_spill]] }
  0x5a   : > { %s1758_s30 = smov (%p1683_p6, %s1756_s30), 0  ;;  %s244_s7 = scalar_lea.vmem [#allocation8], %s808_s22 }
  0x5b   : > { %p805_p11 = scmp.gt.s32.totalorder %s1758_s30, 0  ;;  %s253_s4 = sshll.u32 %s244_s7, 4  ;;  %s254_s4 = int_to_ptr.vmem [resolvable:$true] %s253_s4 }
  0x5c   : > { %p1685_p12 = scmp.lt.s32.totalorder %s1229_s29, 2  ;;  %p1686_p13 = scmp.eq.s32.totalorder %s1229_s29, 0 }
  0x5d   : > { %s1760_s30 = smov (%p805_p11, %s1758_s30), 0  ;;  %s1687_s22 = sadd.s32 1, %s1193_s21 }
  0x5e   : > { %s171_s5 = ssub.s32 %s1754_s3, %s1760_s30  ;;  %p851_p7 = pnand %p1685_p12, %p1401_p2 }
  0x5f   : > { %s249_s2 = scalar_lea.hbm %s1684_s1, %s809_s14  ;;  %s172_s26 = sor.u32 %s171_s5, %s1355_s8 }
  0x60   : > { %s251_s17 = sshll.u32 %s249_s2, 4  ;;  %p173_p0 = scmp.eq.s32.totalorder %s172_s26, 0  ;;  %s252_s17 = int_to_ptr.hbm [resolvable:$true] %s251_s17 }
  0x61   : > { %p184_p8 = por %p182_p4, %p1686_p13  ;;  %s241_s27 = scalar_lea.sflag [#allocation9], %s240_s16 }
  0x62   : > { %s1486_s14 = scalar_select %p173_p0, %s1193_s21, %s1687_s22  }
  0x63   : > { %853 = dma.hbm_to_vmem [thread:$0]  (!%p851_p7), %s252_s17, 128, %s254_s4, %s241_s27  }
  0x64   : > { %p1688_p6 = pmov %p1685_p12  ;;  %p820_p12 = scmp.ge.s32.totalorder %s1229_s29, 1 }
  0x65   : > { %s842_s5 = scalar_select %p184_p8, [#allocation7], [#allocation16] }
  0x66   : > { %p1490_p11 = pnand %p1688_p6, %p184_p8  ;;  %p1690_p5 = pmov %p1688_p6 }
  0x67   : > { %s843_s8 = scalar_select %p184_p8, %s1225_s28, 0 }
  0x68   : > { %s1762_s5 = smov (!%p1690_p5, %s842_s5), [#allocation18]  ;;  %p1691_p2 = pmov %p1690_p5 }
  0x69   : > { %p328_p4 = scmp.lt.s32.totalorder %s1229_s29, 3  ;;  %s297_s7 = sand.u32 1, %s1193_s21  }
  0x6a   : > { %s1764_s8 = smov (!%p1691_p2, %s843_s8), 0  ;;  %s815_s22 = sshll.u32 %s297_s7, 3 }
  0x6b   : > { %s300_s26 = sld [smem:[%s1762_s5 + %s1764_s8]]  ;;  %p1501_p13 = pnand %p820_p12, %p328_p4 }
  0x6c   : > { %s299_s27 = scalar_lea.vmem [#allocation13], %s815_s22 }
  0x6d   : > { %s323_s5 = sshll.u32 %s299_s27, 4  ;;  %s324_s5 = int_to_ptr.vmem [resolvable:$true] %s323_s5 }
  0x71   : > { %s301_s4 = sadd.s32 7, %s300_s26  ;;  %p311_p0 = scmp.eq.s32.totalorder %s300_s26, 0 }
  0x72   : > { %p302_p7 = scmp.lt.s32.totalorder %s301_s4, 0  ;;  %s303_s30 = ssub.s32 0, %s301_s4 }
  0x73   : > { %s816_s16 = smin.u32 %s303_s30, %s301_s4  ;;  %s1693_s30 = sld [smem:[#allocation32_spill]] }
  0x74   : > { %s305_s15 = sshrl.u32 %s816_s16, 3 }
  0x75   : > { %s306_s2 = ssub.s32 0, %s305_s15 }
  0x76   : > { %s1766_s2 = smov (!%p302_p7, %s306_s2), %s305_s15 }
  0x77   : > { %s817_s17 = sadd.s32 4294967295, %s1766_s2  ;;  %s1516_s2 = sand.u32 (!%p1501_p13), 1, %s1213_s25  }
  0x78   : > { %p309_p5 = scmp.gt.s32.totalorder %s817_s17, 0  ;;  %s821_s7 = sshll.u32 (!%p1501_p13), %s1516_s2, 3 }
  0x79   : > { %s338_s11 = scalar_lea.vmem (!%p1501_p13), [#allocation8], %s821_s7 }
  0x7a   : > { %s1768_s17 = smov (!%p309_p5, %s817_s17), 0 }
  0x7b   : > { %s1770_s17 = smov (%p311_p0, %s1768_s17), 0 }
  0x7c   : > { %p818_p8 = scmp.gt.s32.totalorder %s1770_s17, 0 }
  0x7e   : > { %s1772_s17 = smov (%p818_p8, %s1770_s17), 0 }
  0x7f   : > { %s317_s8 = sadd.s32 %s1225_s28, %s1772_s17  ;;  %332 = sbr.rel (%p1501_p13) target bundleno = 1310 (0x51e), region = 32 }
  0x80   : > { %s819_s1 = sshll.u32 %s317_s8, 3  ;;  %s335_s17 = scalar_lea.sflag (!%p1501_p13), [#allocation9], %s1516_s2 }
  0x81   : > { %s319_s16 = scalar_lea.hbm %s1693_s30, %s819_s1 }
  0x82   : > { %s321_s15 = sshll.u32 %s319_s16, 4  ;;  %s322_s15 = int_to_ptr.hbm [resolvable:$true] %s321_s15 }
  0x83   : > { %863 = dma.hbm_to_vmem [thread:$0]  (!%p1490_p11), %s322_s15, 128, %s324_s5, %s1389_s10  }
  0x84   : > { %1168 = dma.done.wait (%p1379_p1), %s335_s17, 128  }
  0x85   : > { %1170 = vsyncadd (%p1379_p1), %s335_s17, 4294967168  ;;  %s344_s1 = sand.u32 1, %s1349_s6   ;;  %s346_s10 = sand.u32 1, %s1201_s0  }
  0x86   : > { %s1528_s3 = sshll.u32 %s346_s10, 3  ;;  %s345_s13 = scalar_lea.sflag [#allocation12], %s344_s1 }
  0x87   : > { %s348_s22 = scalar_lea.vmem [#allocation11], %s1528_s3 }
  0x88   : > { %1172 = dma.done.wait (%p1418_p9), %s345_s13, 128  }
  0x89   : > { %1174 = vsyncadd (%p1418_p9), %s345_s13, 4294967168  ;;  %s356_s27 = sand.u32 1, %s1189_s20   ;;  %p1695_p1 = scmp.ne.s32.totalorder %s1679_s19, 0 }
  0x8a   : > { %s1536_s5 = sshll.u32 %s356_s27, 3 }
  0x8b   : > { %s358_s8 = scalar_lea.vmem [#allocation13], %s1536_s5 }
  0x8c   : > { %1176 = dma.done.wait (%p1695_p1), %s345_s13, 128  }
  0x8d   : > { %1178 = vsyncadd (%p1695_p1), %s345_s13, 4294967168  ;;  %s1696_s6 = sld [smem:[#allocation25_spill]]  ;;  %vm426_vm0 = vcmask 7168   ;;  %vm429_vm1 = vcmask 261120   ;;  %v1232_v0 = vmov -inf   ;;  %v1233_v1 = vmov 0.0  }
  0x8e   : > { %427 = vst.msk [vmem:[#allocation2] sm:$0xff] %vm426_vm0, %v1232_v0  ;;  %v431_v2 = vld [vmem:[%s338_s11] sm:$0xff]  ;;  %s1561_s19 = scalar_lea.vmem [#allocation14], %s821_s7 }
  0x8f   : > { %428 = vst.msk [vmem:[#allocation3] sm:$0xff] %vm426_vm0, %v1233_v1  ;;  %v432_v3 = vmul.f32 0.17677669, %v431_v2 }
  0x90   : > { %430 = vst.msk [vmem:[#allocation4] sm:$0xff] %vm429_vm1, %v1233_v1 }
  0x91   : > { %433 = vst.msk [vmem:[#allocation5] sm:$0xff] %vm429_vm1, %v432_v3 }
  0x93   : > { %s1544_s4 = sld [smem:[#allocation7 + %s1696_s6]] }
  0x99   : > { %p825_p9 = scmp.gt.s32.totalorder %s1544_s4, 0  ;;  %p438_p6 = scmp.eq.s32.totalorder %s1544_s4, 0 }
  0x9a   : > { %p826_p11 = scmp.ge.s32.totalorder %s1544_s4, 8 }
  0x9b   : > { %p1552_p2 = por %p825_p9, %p438_p6 }
  0x9d   : > { %p441_p12 = pnand %p826_p11, %p1552_p2 }
  0x9f   : > { %444 = sbr.rel (%p441_p12) target bundleno = 668 (0x29c), region = 52 }
  0xa4   : > { %v446_v4 = vld [vmem:[%s348_s22] sm:$0xff]  ;;  %vm475_vm2 = vcmask 64512   ;;  %v1234_v8 = vmov 0   ;;  %v474_v9 = vld [vmem:[#allocation2] sm:$0xff]  ;;  %v491_v22 = vld [vmem:[#allocation3] sm:$0xff] }
  0xa5   : > { %827 = vmatpush.xpose.msk.msra.mxu0 %vm429_vm1, %v446_v4  ;;  %v445_v5 = vld [vmem:[#allocation5] sm:$0xff]  ;;  %972 = vset.pattern.permute.xlu0 %v1234_v8  ;;  %v499_v15 = vld [vmem:[%s358_s8] sm:$0xff]  ;;  %v523_v26 = vld [vmem:[#allocation4] sm:$0xff] }
  0xa6   : > { %973 = vset.pattern.permute.xlu1 %v1234_v8  ;;  %518 = vmatpush.msra.mxu1 %v499_v15 }
  0xa8   : > { %828 = vmatmul.msk.f32.vlgmr.msra.gmra.mxu0 %vm429_vm1, %v445_v5 }
 0x125   : > { %v471_v6 = vpop.f32.mrf.mxu0 }
 0x126   : > { %v476_v7 = vsel %vm475_vm2, %v471_v6, -inf }
 0x127   : > { %477 = vmax.xlane.f32.xlu0 %v476_v7 }
 0x19a   : > { %v478_v10 = vpop.xlane.xlu0 %477 }
 0x19b   : > { %v479_v11 = vmax.f32 %v474_v9, %v478_v10 }
 0x19d   : > { %v480_v12 = vsub.f32 %v474_v9, %v479_v11  ;;  %532 = vst.msk [vmem:[#allocation2] sm:$0xff] %vm426_vm0, %v479_v11  ;;  %485 = vperm.xlu0 %972, %v479_v11  }
 0x19f   : > { %v481_v13 = vmul.f32 1.442695, %v480_v12 }
 0x1a1   : > { %974 = vpow2.f32 %v481_v13 }
 0x1a7   : > { %v975_v14 = vpop.eup %974 }
 0x1a8   : > { %526 = vperm.xlu1 %973, %v975_v14   ;;  %v492_v23 = vmul.f32 %v975_v14, %v491_v22 }
 0x20f   : > { %v486_v16 = vpop.permute.xlu0 %485 }
 0x210   : > { %v488_v17 = vsub.f32 %v471_v6, %v486_v16 }
 0x212   : > { %v489_v18 = vmul.f32 1.442695, %v488_v17 }
 0x214   : > { %976 = vpow2.f32 %v489_v18 }
 0x21a   : > { %v977_v19 = vpop.eup %976  ;;  %v527_v21 = vpop.permute.xlu1 %526 }
 0x21b   : > { %829 = vmatmul.msk.f32.vlgmr.msra.gmra.mxu1 %vm475_vm2, %v977_v19  ;;  %v493_v20 = vsel %vm475_vm2, %v977_v19, 0.0  ;;  %v529_v27 = vmul.f32 %v527_v21, %v523_v26 }
 0x21c   : > { %494 = vadd.xlane.f32.xlu1 %v493_v20 }
 0x28f   : > { %v495_v24 = vpop.xlane.xlu1 %494 }
 0x290   : > { %v496_v25 = vadd.f32 %v495_v24, %v492_v23 }
 0x292   : > { %498 = vst.msk [vmem:[#allocation3] sm:$0xff] %vm426_vm0, %v496_v25 }
 0x298   : > { %v520_v28 = vpop.f32.mrf.mxu1 }
 0x299   : > { %v530_v29 = vadd.f32 %v529_v27, %v520_v28 }
 0x29b   : > { %531 = vst.msk [vmem:[#allocation4] sm:$0xff] %vm429_vm1, %v530_v29 }
 0x29c PF: > { %p830_p4 = scmp.lt.s32.totalorder %s1544_s4, 8 }
 0x29e   : > { %p534_p13 = pnand %p830_p4, %p1552_p2 }
 0x2a0   : > { %537 = sbr.rel (%p534_p13) target bundleno = 1182 (0x49e), region = 56 }
 0x2a5   : > { %v539_v30 = vld [vmem:[%s348_s22] sm:$0xff]  ;;  %v567_v32 = vlaneseq  ;;  %v571_v34 = vstv %s1544_s4  ;;  %vm575_vm4 = vcmask 64512   ;;  %v1235_v38 = vmov 0   ;;  %v574_v39 = vld [vmem:[#allocation2] sm:$0xff]  ;;  %v591_v52 = vld [vmem:[#allocation3] sm:$0xff] }
 0x2a6   : > { %831 = vmatpush.xpose.msk.msra.mxu0 %vm429_vm1, %v539_v30  ;;  %v538_v31 = vld [vmem:[#allocation5] sm:$0xff]  ;;  %978 = vset.pattern.permute.xlu0 %v1235_v38  ;;  %v599_v45 = vld [vmem:[%s358_s8] sm:$0xff]  ;;  %v623_v56 = vld [vmem:[#allocation4] sm:$0xff] }
 0x2a7   : > { %v568_v33 = vand.u32 127, %v567_v32  ;;  %979 = vset.pattern.permute.xlu1 %v1235_v38  ;;  %618 = vmatpush.msra.mxu1 %v599_v45 }
 0x2a9   : > { %832 = vmatmul.msk.f32.vlgmr.msra.gmra.mxu0 %vm429_vm1, %v538_v31  ;;  %vm572_vm3 = vcmp.lt.s32.totalorder %v568_v33, %v571_v34 }
 0x326   : > { %v564_v35 = vpop.f32.mrf.mxu0 }
 0x327   : > { %v573_v36 = vsel %vm572_vm3, %v564_v35, -1000000.0 }
 0x328   : > { %v576_v37 = vsel %vm575_vm4, %v573_v36, -inf }
 0x329   : > { %577 = vmax.xlane.f32.xlu0 %v576_v37 }
 0x39c   : > { %v578_v40 = vpop.xlane.xlu0 %577 }
 0x39d   : > { %v579_v41 = vmax.f32 %v574_v39, %v578_v40 }
 0x39f   : > { %v580_v42 = vsub.f32 %v574_v39, %v579_v41  ;;  %632 = vst.msk [vmem:[#allocation2] sm:$0xff] %vm426_vm0, %v579_v41  ;;  %585 = vperm.xlu0 %978, %v579_v41  }
 0x3a1   : > { %v581_v43 = vmul.f32 1.442695, %v580_v42 }
 0x3a3   : > { %980 = vpow2.f32 %v581_v43 }
 0x3a9   : > { %v981_v44 = vpop.eup %980 }
 0x3aa   : > { %626 = vperm.xlu1 %979, %v981_v44   ;;  %v592_v53 = vmul.f32 %v981_v44, %v591_v52 }
 0x411   : > { %v586_v46 = vpop.permute.xlu0 %585 }
 0x412   : > { %v588_v47 = vsub.f32 %v573_v36, %v586_v46 }
 0x414   : > { %v589_v48 = vmul.f32 1.442695, %v588_v47 }
 0x416   : > { %982 = vpow2.f32 %v589_v48 }
 0x41c   : > { %v983_v49 = vpop.eup %982  ;;  %v627_v51 = vpop.permute.xlu1 %626 }
 0x41d   : > { %833 = vmatmul.msk.f32.vlgmr.msra.gmra.mxu1 %vm575_vm4, %v983_v49  ;;  %v593_v50 = vsel %vm575_vm4, %v983_v49, 0.0  ;;  %v629_v57 = vmul.f32 %v627_v51, %v623_v56 }
 0x41e   : > { %594 = vadd.xlane.f32.xlu1 %v593_v50 }
 0x491   : > { %v595_v54 = vpop.xlane.xlu1 %594 }
 0x492   : > { %v596_v55 = vadd.f32 %v595_v54, %v592_v53 }
 0x494   : > { %598 = vst.msk [vmem:[#allocation3] sm:$0xff] %vm426_vm0, %v596_v55 }
 0x49a   : > { %v620_v58 = vpop.f32.mrf.mxu1 }
 0x49b   : > { %v630_v59 = vadd.f32 %v629_v57, %v620_v58 }
 0x49d   : > { %631 = vst.msk [vmem:[#allocation4] sm:$0xff] %vm429_vm1, %v630_v59 }
 0x49e PF: > { %v636_v60 = vld [vmem:[#allocation3] sm:$0xff]  ;;  %s1698_s30 = sld [smem:[#allocation25_spill]]  ;;  %v1236_v61 = vmov 0   ;;  %s661_s11 = sshll.u32 %s1561_s19, 4  ;;  %s662_s11 = int_to_ptr.vmem [resolvable:$true] %s661_s11 }
 0x49f   : > { %984 = vset.pattern.permute.xlu0 %v1236_v61  ;;  %985 = vrcp.f32 %v636_v60  ;;  %s1699_s7 = sld [smem:[#allocation33_spill]]  ;;  %s648_s10 = scalar_lea.sflag [#allocation10], %s1516_s2 }
 0x4a4   : > { %s835_s16 = sshll.u32 %s1698_s30, 3  ;;  %v638_v63 = vld [vmem:[#allocation4] sm:$0xff] }
 0x4a5   : > { %v986_v62 = vpop.eup %985  ;;  %s659_s17 = scalar_lea.hbm %s1699_s7, %s835_s16  ;;  %s1109_s5 = scalar_lea.hbm %s1699_s7, 16 }
 0x4a6   : > { %641 = vperm.xlu0 %984, %v986_v62   ;;  %s663_s1 = sshll.u32 %s659_s17, 4  ;;  %s664_s1 = int_to_ptr.hbm [resolvable:$true] %s663_s1 }
 0x4a7   : > { %s1103_s3 = sshra.s32 %s664_s1, 4  ;;  %s1104_s3 = int_to_ptr.hbm [resolvable:$true] %s1103_s3 }
 0x4a8   : > { %s1105_s13 = scalar_lea.hbm %s1104_s3, 8  ;;  %p1110_p8 = scmp.lt.s32.totalorder %s1104_s3, %s1699_s7 }
 0x4a9   : > { %p1106_p7 = scmp.ne.s32.totalorder %s1104_s3, %s1105_s13  ;;  %p1111_p1 = scmp.lt.s32.totalorder %s1109_s5, %s1105_s13 }
 0x4ab   : > { %p1107_p5 = pnand %p1106_p7, %p1450_p10  ;;  %p1112_p9 = por %p1111_p1, %p1110_p8 }
 0x4ad   : > { %p1108_p0 = pneg %p1107_p5 }
 0x4af   : > { %p1113_p6 = pnand %p1112_p9, %p1108_p0 }
 0x518   : > { %v642_v0 = vpop.permute.xlu0 %641 }
 0x519   : > { %v644_v1 = vmul.f32 %v642_v0, %v638_v63 }
 0x51b   : > { %646 = vst.msk [vmem:[%s1561_s19] sm:$0xff] %vm429_vm1, %v644_v1 }
 0x51c   : > { %1116 = shalt.err (!%p1113_p6)
}
 0x51d   : > { %848 = dma.vmem_to_hbm [thread:$0]  (%p1450_p10), %s662_s11, 128, %s664_s1, %s648_s10  }
 0x51e PF: > { %s675_s2 = sand.u32 1, %s1209_s24   ;;  %p1700_p11 = scmp.ge.s32.totalorder %s1229_s29, 2 }
 0x51f   : > { %s676_s4 = scalar_lea.sflag [#allocation10], %s675_s2 }
 0x520   : > { %p865_p2 = pnand %p1700_p11, %p1463_p3 }
 0x522   : > { %p866_p12 = pneg %p865_p2 }
 0x524   : > { %1180 = dma.done.wait (%p866_p12), %s676_s4, 128  }
 0x525   : > { %1182 = vsyncadd (%p866_p12), %s676_s4, 4294967168  ;;  %s31_s29 = sadd.s32 1, %s1229_s29   ;;  %s1701_s9 = sld [smem:[#allocation29_spill]] }
 0x526   : > { %p28_p4 = scmp.ge.s32.totalorder %s31_s29, 4   ;;  %s1702_s18 = sld [smem:[#allocation24_spill]] }
 0x527   : > { %s1703_s26 = sld [smem:[#allocation27_spill]]  ;;  %s1705_s19 = smov %s1189_s20 }
 0x528   : > { %s1704_s12 = sld [smem:[#allocation26_spill]]  ;;  %s1706_s20 = smov %s1193_s21 }
 0x529   : > { %s1707_s21 = smov %s1486_s14  ;;  %s1708_s22 = smov %s1201_s0 }
 0x52a   : > { %s1709_s0 = smov %s1205_s23  ;;  %s1711_s24 = smov %s1213_s25 }
 0x52b   : > { %s1710_s23 = smov %s1701_s9  ;;  %s1713_s27 = smov %s1225_s28 }
 0x52c   : > { %s1712_s25 = smov %s1702_s18  ;;  %30 = sbr.rel (!%p28_p4) target bundleno = 20 (0x14), region = 117 }
 0x52e   : > { %s1714_s28 = smov %s1704_s12 }
 0x531   :  { %682 = vsyncpa [#allocation9], 1 }
 0x532   :  { %684 = vsyncpa [#allocation9 + $0x1], 1 }
 0x533   :  { %685 = vsyncpa [#allocation12], 1 }
 0x534   :  { %687 = vsyncpa [#allocation12 + $0x1], 1 }
 0x535   :  { %688 = vsyncpa [#allocation10], 1 }
 0x536   :  { %690 = vsyncpa [#allocation10 + $0x1], 1 }

</bundles_post_ra>
